<compile_context>
chip_gen: v7x
topology: tpu7x:2x2x1
jax: 0.10.0
libtpu: 0.0.40
codegen_flags: <defaults>
</compile_context>

<pallas_src>
import functools

import jax
import jax.numpy as jnp
from jax.experimental import pallas as pl
from jax.experimental.pallas import tpu as pltpu

_LANES = 128

_SEMANTIC_WEIGHTS = (1.5105, 16.6591, 29.4238, 34.6315, 40.0845,
                     41.4357, 47.9794, 45.3725, 44.9)
_BINARY_WEIGHTS = (1.5121, 10.2388)


def _fused_wce_kernel(sem_ref, sal_ref, sgt_ref, bgt_ref,
                      out_ref, acc_swn, acc_sw, acc_bwn, acc_bw,
                      *, w_sem, w_bin, total_pix, need_mask):
    """Fused weighted-CE partial sums for the semantic (C=9) and binary (C=2) heads.

    sem_ref : (C_sem, block_rows, 128) logits block       (VMEM)
    sal_ref : (C_bin, block_rows, 128) logits block       (VMEM)
    sgt_ref / bgt_ref : (block_rows, 128) int32 targets   (VMEM)
    out_ref : (4,) f32 [sem_wnll, sem_w, bin_wnll, bin_w] (SMEM)
    acc_*   : (block_rows, 128) f32 element-wise accumulators (VMEM scratch)
    """
    n = pl.program_id(0)
    r = pl.program_id(1)
    is_first = (n == 0) & (r == 0)
    is_last = ((n == pl.num_programs(0) - 1) &
               (r == pl.num_programs(1) - 1))

    @pl.when(is_first)
    def _():
        acc_swn[...] = jnp.zeros_like(acc_swn)
        acc_sw[...] = jnp.zeros_like(acc_sw)
        acc_bwn[...] = jnp.zeros_like(acc_bwn)
        acc_bw[...] = jnp.zeros_like(acc_bw)

    block_rows, lanes = sgt_ref.shape

    if need_mask:
        row_idx = jax.lax.broadcasted_iota(jnp.int32, (block_rows, lanes), 0)
        lane_idx = jax.lax.broadcasted_iota(jnp.int32, (block_rows, lanes), 1)
        pix = (r * block_rows + row_idx) * lanes + lane_idx
        valid = pix < total_pix
    else:
        valid = None

    def accumulate(logits_ref, tgt_ref, w_vals, acc_wn, acc_w):
        num_classes = logits_ref.shape[0]
        tgt = tgt_ref[...]                                   # (R, 128) int32
        # pass 1: per-pixel max over classes (leading axis -> pure VPU)
        m = logits_ref[0].astype(jnp.float32)
        for c in range(1, num_classes):
            m = jnp.maximum(m, logits_ref[c].astype(jnp.float32))
        # pass 2: sum exp(x-m); select target logit & class weight per pixel
        ssum = jnp.zeros_like(m)
        tgt_logit = jnp.zeros_like(m)
        wt = jnp.zeros_like(m)
        for c in range(num_classes):
            xc = logits_ref[c].astype(jnp.float32)
            ssum = ssum + jnp.exp(xc - m)
            hit = tgt == c
            tgt_logit = jnp.where(hit, xc, tgt_logit)
            wt = jnp.where(hit, w_vals[c], wt)               # compile-time const weight
        nll = (jnp.log(ssum) + m) - tgt_logit
        if valid is not None:
            # where-mask (not just *0): out-of-range tail data may be non-finite.
            nll = jnp.where(valid, nll, 0.0)
            wt = jnp.where(valid, wt, 0.0)
        acc_wn[...] += wt * nll
        acc_w[...] += wt

    accumulate(sem_ref, sgt_ref, w_sem, acc_swn, acc_sw)
    accumulate(sal_ref, bgt_ref, w_bin, acc_bwn, acc_bw)

    # Full cross-lane reductions + SMEM scalar writes only once, on the last step.
    @pl.when(is_last)
    def _():
        out_ref[0] = jnp.sum(acc_swn[...])
        out_ref[1] = jnp.sum(acc_sw[...])
        out_ref[2] = jnp.sum(acc_bwn[...])
        out_ref[3] = jnp.sum(acc_bw[...])


@functools.partial(jax.jit, static_argnames=("class_weights_semantic",
                                              "class_weights_binary",
                                              "block_rows_target"))
def eeemodel_loss_forward(semantic_out, sal_out, semantic_gt, binary_gt,
                          class_weights_semantic=_SEMANTIC_WEIGHTS,
                          class_weights_binary=_BINARY_WEIGHTS,
                          block_rows_target=128):
    N, c_sem, H, W = semantic_out.shape
    n2, c_bin, h2, w2 = sal_out.shape
    assert (N, H, W) == (n2, h2, w2)
    assert len(class_weights_semantic) == c_sem
    assert len(class_weights_binary) == c_bin
    P = H * W

    # Free, contiguous reshapes (no transpose, no f32 upcast): NCHW -> (N, C, H*W)
    sem = semantic_out.reshape(N, c_sem, P)
    sal = sal_out.reshape(N, c_bin, P)
    sgt = semantic_gt.reshape(N, P).astype(jnp.int32)
    bgt = binary_gt.reshape(N, P).astype(jnp.int32)

    pad = (-P) % _LANES
    if pad:
        # TODO(synk): rare fallback (H*W not a multiple of 128) costs one copy;
        # the padded pixels are masked out inside the kernel.
        sem = jnp.pad(sem, ((0, 0), (0, 0), (0, pad)))
        sal = jnp.pad(sal, ((0, 0), (0, 0), (0, pad)))
        sgt = jnp.pad(sgt, ((0, 0), (0, pad)))
        bgt = jnp.pad(bgt, ((0, 0), (0, pad)))
    rows = (P + pad) // _LANES

    # Lane-dense (rows, 128) pixel slabs with the class axis leading.
    sem = sem.reshape(N, c_sem, rows, _LANES)
    sal = sal.reshape(N, c_bin, rows, _LANES)
    sgt = sgt.reshape(N, rows, _LANES)
    bgt = bgt.reshape(N, rows, _LANES)

    if rows <= block_rows_target:
        block_rows = rows                              # single row-tile (full dim)
    else:
        block_rows = max(8, (block_rows_target // 8) * 8)
    row_tiles = pl.cdiv(rows, block_rows)
    need_mask = (pad != 0) or (rows % block_rows != 0)

    kernel = functools.partial(
        _fused_wce_kernel,
        w_sem=tuple(float(x) for x in class_weights_semantic),
        w_bin=tuple(float(x) for x in class_weights_binary),
        total_pix=P, need_mask=need_mask)

    grid_spec = pltpu.PrefetchScalarGridSpec(
        num_scalar_prefetch=0,
        grid=(N, row_tiles),
        in_specs=[
            pl.BlockSpec((None, c_sem, block_rows, _LANES), lambda n, r: (n, 0, r, 0)),
            pl.BlockSpec((None, c_bin, block_rows, _LANES), lambda n, r: (n, 0, r, 0)),
            pl.BlockSpec((None, block_rows, _LANES), lambda n, r: (n, r, 0)),
            pl.BlockSpec((None, block_rows, _LANES), lambda n, r: (n, r, 0)),
        ],
        out_specs=pl.BlockSpec(memory_space=pltpu.SMEM),
        scratch_shapes=[pltpu.VMEM((block_rows, _LANES), jnp.float32)
                        for _ in range(4)],
    )

    # TODO(synk): on v7x (2 TensorCores) a leading "parallel" grid axis with
    # per-core accumulator rows would let both cores drive HBM (~2x); a single
    # shared accumulator keeps this portable and correct on all generations.
    sums = pl.pallas_call(
        kernel,
        out_shape=jax.ShapeDtypeStruct((4,), jnp.float32),
        grid_spec=grid_spec,
        compiler_params=pltpu.CompilerParams(
            dimension_semantics=("arbitrary", "arbitrary")),
    )(sem, sal, sgt, bgt)

    sem_loss = sums[0] / sums[1]
    bin_loss = sums[2] / sums[3]
    return sem_loss * 10.0 + 5.0 * bin_loss


class EeemodelLossPallas:
    """JAX/Pallas equivalent of the PyTorch eeemodelLoss module."""

    def __init__(self):
        self.class_weight_semantic = jnp.array(_SEMANTIC_WEIGHTS, dtype=jnp.float32)
        self.class_weight_binary = jnp.array(_BINARY_WEIGHTS, dtype=jnp.float32)

    def __call__(self, inputs, targets):
        semantic_gt, binary_gt = targets
        semantic_out, sal_out = inputs
        return eeemodel_loss_forward(
            semantic_out, sal_out, semantic_gt, binary_gt,
            class_weights_semantic=_SEMANTIC_WEIGHTS,
            class_weights_binary=_BINARY_WEIGHTS)


def _ref_weighted_ce(logits_nchw, targets_nhw, w):
    """Pure-JAX reference matching torch.nn.CrossEntropyLoss(weight=w)."""
    C = logits_nchw.shape[1]
    lp = jax.nn.log_softmax(logits_nchw.astype(jnp.float32), axis=1)
    oh = jax.nn.one_hot(targets_nhw, C, axis=1, dtype=jnp.float32)
    nll = -jnp.sum(oh * lp, axis=1)             # (N, H, W)
    wt = w[targets_nhw]                         # (N, H, W)
    return jnp.sum(wt * nll) / jnp.sum(wt)


if __name__ == "__main__":
    loss_fn = EeemodelLossPallas()

    def run_case(key, N, H, W):
        k1, k2, k3, k4 = jax.random.split(key, 4)
        sem = jax.random.normal(k1, (N, 9, H, W), jnp.float32)
        sal = jax.random.normal(k2, (N, 2, H, W), jnp.float32)
        sgt = jax.random.randint(k3, (N, H, W), 0, 9, jnp.int32)
        bgt = jax.random.randint(k4, (N, H, W), 0, 2, jnp.int32)

        out = jax.block_until_ready(loss_fn((sem, sal), (sgt, bgt)))
        ref = (10.0 * _ref_weighted_ce(sem, sgt, loss_fn.class_weight_semantic)
               + 5.0 * _ref_weighted_ce(sal, bgt, loss_fn.class_weight_binary))
        ref = jax.block_until_ready(ref)
        assert jnp.allclose(out, ref, rtol=1e-4, atol=1e-4), (N, H, W, out, ref)

    key = jax.random.PRNGKey(0)
    k1, k2, k3 = jax.random.split(key, 3)
    run_case(k1, 2, 16, 16)     # aligned path: H*W multiple of 128, one row-tile
    run_case(k2, 2, 20, 20)     # lane-pad path: H*W=400 -> in-kernel tail mask
    run_case(k3, 1, 132, 128)   # ragged row-tile path: rows=132 > block_rows=128
    print("KERNEL_OK")
</pallas_src>

<mosaic_0001>
module attributes {stable_mosaic.version = 11 : i64} {
  func.func @_fused_wce_kernel(%arg0: i32, %arg1: i32, %arg2: memref<1x9x2x128xf32, #tpu.memory_space<vmem>>, %arg3: memref<1x2x2x128xf32, #tpu.memory_space<vmem>>, %arg4: memref<1x2x128xi32, #tpu.memory_space<vmem>>, %arg5: memref<1x2x128xi32, #tpu.memory_space<vmem>>, %arg6: memref<4xf32, #tpu.memory_space<smem>>, %arg7: memref<2x128xf32, #tpu.memory_space<vmem>>, %arg8: memref<2x128xf32, #tpu.memory_space<vmem>>, %arg9: memref<2x128xf32, #tpu.memory_space<vmem>>, %arg10: memref<2x128xf32, #tpu.memory_space<vmem>>) attributes {dimension_semantics = [#tpu.dimension_semantics<arbitrary>, #tpu.dimension_semantics<arbitrary>], iteration_bounds = array<i64: 2, 1>, scalar_prefetch = 0 : i64, scratch_operands = 4 : i64, tpu.core_type = #tpu.core_type<tc>, window_params = [{transform_indices = @transform_0, window_bounds = array<i64: 1, 9, 2, 128>}, {transform_indices = @transform_1, window_bounds = array<i64: 1, 2, 2, 128>}, {transform_indices = @transform_2, window_bounds = array<i64: 1, 2, 128>}, {transform_indices = @transform_3, window_bounds = array<i64: 1, 2, 128>}, {transform_indices = @transform_4, window_bounds = array<i64: 4>}]} {
    %c0_i32 = arith.constant 0 : i32
    %0 = arith.cmpi eq, %arg0, %c0_i32 : i32
    %c0_i32_0 = arith.constant 0 : i32
    %1 = arith.cmpi eq, %arg1, %c0_i32_0 : i32
    %2 = arith.andi %0, %1 : i1
    %c1_i32 = arith.constant 1 : i32
    %3 = arith.cmpi eq, %arg0, %c1_i32 : i32
    %c0_i32_1 = arith.constant 0 : i32
    %4 = arith.cmpi eq, %arg1, %c0_i32_1 : i32
    %5 = arith.andi %3, %4 : i1
    %6 = arith.extui %2 : i1 to i32
    %c0_i32_2 = arith.constant 0 : i32
    %7 = arith.cmpi ne, %6, %c0_i32_2 : i32
    scf.if %7 {
      %cst_125 = arith.constant 0.000000e+00 : f32
      %181 = vector.broadcast %cst_125 : f32 to vector<2x128xf32>
      %c0_126 = arith.constant 0 : index
      %c0_127 = arith.constant 0 : index
      %182 = vector.load %arg7[%c0_126, %c0_127] : memref<2x128xf32, #tpu.memory_space<vmem>>, vector<2x128xf32>
      tpu.vector_store %arg7[%c0_126, %c0_127], %181 {strides = array<i32>} : memref<2x128xf32, #tpu.memory_space<vmem>>, vector<2x128xf32>,
      %cst_128 = arith.constant 0.000000e+00 : f32
      %183 = vector.broadcast %cst_128 : f32 to vector<2x128xf32>
      %c0_129 = arith.constant 0 : index
      %c0_130 = arith.constant 0 : index
      %184 = vector.load %arg8[%c0_129, %c0_130] : memref<2x128xf32, #tpu.memory_space<vmem>>, vector<2x128xf32>
      tpu.vector_store %arg8[%c0_129, %c0_130], %183 {strides = array<i32>} : memref<2x128xf32, #tpu.memory_space<vmem>>, vector<2x128xf32>,
      %cst_131 = arith.constant 0.000000e+00 : f32
      %185 = vector.broadcast %cst_131 : f32 to vector<2x128xf32>
      %c0_132 = arith.constant 0 : index
      %c0_133 = arith.constant 0 : index
      %186 = vector.load %arg9[%c0_132, %c0_133] : memref<2x128xf32, #tpu.memory_space<vmem>>, vector<2x128xf32>
      tpu.vector_store %arg9[%c0_132, %c0_133], %185 {strides = array<i32>} : memref<2x128xf32, #tpu.memory_space<vmem>>, vector<2x128xf32>,
      %cst_134 = arith.constant 0.000000e+00 : f32
      %187 = vector.broadcast %cst_134 : f32 to vector<2x128xf32>
      %c0_135 = arith.constant 0 : index
      %c0_136 = arith.constant 0 : index
      %188 = vector.load %arg10[%c0_135, %c0_136] : memref<2x128xf32, #tpu.memory_space<vmem>>, vector<2x128xf32>
      tpu.vector_store %arg10[%c0_135, %c0_136], %187 {strides = array<i32>} : memref<2x128xf32, #tpu.memory_space<vmem>>, vector<2x128xf32>,
    } else {
    }
    %c0 = arith.constant 0 : index
    %c0_3 = arith.constant 0 : index
    %c0_4 = arith.constant 0 : index
    %8 = vector.load %arg4[%c0, %c0_3, %c0_4] : memref<1x2x128xi32, #tpu.memory_space<vmem>>, vector<1x2x128xi32>
    %9 = vector.shape_cast %8 : vector<1x2x128xi32> to vector<2x128xi32>
    %c0_5 = arith.constant 0 : index
    %c0_6 = arith.constant 0 : index
    %c0_7 = arith.constant 0 : index
    %c0_8 = arith.constant 0 : index
    %10 = vector.load %arg2[%c0_5, %c0_6, %c0_7, %c0_8] : memref<1x9x2x128xf32, #tpu.memory_space<vmem>>, vector<1x1x2x128xf32>
    %11 = vector.shape_cast %10 : vector<1x1x2x128xf32> to vector<2x128xf32>
    %c0_9 = arith.constant 0 : index
    %c1 = arith.constant 1 : index
    %c0_10 = arith.constant 0 : index
    %c0_11 = arith.constant 0 : index
    %12 = vector.load %arg2[%c0_9, %c1, %c0_10, %c0_11] : memref<1x9x2x128xf32, #tpu.memory_space<vmem>>, vector<1x1x2x128xf32>
    %13 = vector.shape_cast %12 : vector<1x1x2x128xf32> to vector<2x128xf32>
    %14 = arith.maximumf %11, %13 : vector<2x128xf32>
    %c0_12 = arith.constant 0 : index
    %c2 = arith.constant 2 : index
    %c0_13 = arith.constant 0 : index
    %c0_14 = arith.constant 0 : index
    %15 = vector.load %arg2[%c0_12, %c2, %c0_13, %c0_14] : memref<1x9x2x128xf32, #tpu.memory_space<vmem>>, vector<1x1x2x128xf32>
    %16 = vector.shape_cast %15 : vector<1x1x2x128xf32> to vector<2x128xf32>
    %17 = arith.maximumf %14, %16 : vector<2x128xf32>
    %c0_15 = arith.constant 0 : index
    %c3 = arith.constant 3 : index
    %c0_16 = arith.constant 0 : index
    %c0_17 = arith.constant 0 : index
    %18 = vector.load %arg2[%c0_15, %c3, %c0_16, %c0_17] : memref<1x9x2x128xf32, #tpu.memory_space<vmem>>, vector<1x1x2x128xf32>
    %19 = vector.shape_cast %18 : vector<1x1x2x128xf32> to vector<2x128xf32>
    %20 = arith.maximumf %17, %19 : vector<2x128xf32>
    %c0_18 = arith.constant 0 : index
    %c4 = arith.constant 4 : index
    %c0_19 = arith.constant 0 : index
    %c0_20 = arith.constant 0 : index
    %21 = vector.load %arg2[%c0_18, %c4, %c0_19, %c0_20] : memref<1x9x2x128xf32, #tpu.memory_space<vmem>>, vector<1x1x2x128xf32>
    %22 = vector.shape_cast %21 : vector<1x1x2x128xf32> to vector<2x128xf32>
    %23 = arith.maximumf %20, %22 : vector<2x128xf32>
    %c0_21 = arith.constant 0 : index
    %c5 = arith.constant 5 : index
    %c0_22 = arith.constant 0 : index
    %c0_23 = arith.constant 0 : index
    %24 = vector.load %arg2[%c0_21, %c5, %c0_22, %c0_23] : memref<1x9x2x128xf32, #tpu.memory_space<vmem>>, vector<1x1x2x128xf32>
    %25 = vector.shape_cast %24 : vector<1x1x2x128xf32> to vector<2x128xf32>
    %26 = arith.maximumf %23, %25 : vector<2x128xf32>
    %c0_24 = arith.constant 0 : index
    %c6 = arith.constant 6 : index
    %c0_25 = arith.constant 0 : index
    %c0_26 = arith.constant 0 : index
    %27 = vector.load %arg2[%c0_24, %c6, %c0_25, %c0_26] : memref<1x9x2x128xf32, #tpu.memory_space<vmem>>, vector<1x1x2x128xf32>
    %28 = vector.shape_cast %27 : vector<1x1x2x128xf32> to vector<2x128xf32>
    %29 = arith.maximumf %26, %28 : vector<2x128xf32>
    %c0_27 = arith.constant 0 : index
    %c7 = arith.constant 7 : index
    %c0_28 = arith.constant 0 : index
    %c0_29 = arith.constant 0 : index
    %30 = vector.load %arg2[%c0_27, %c7, %c0_28, %c0_29] : memref<1x9x2x128xf32, #tpu.memory_space<vmem>>, vector<1x1x2x128xf32>
    %31 = vector.shape_cast %30 : vector<1x1x2x128xf32> to vector<2x128xf32>
    %32 = arith.maximumf %29, %31 : vector<2x128xf32>
    %c0_30 = arith.constant 0 : index
    %c8 = arith.constant 8 : index
    %c0_31 = arith.constant 0 : index
    %c0_32 = arith.constant 0 : index
    %33 = vector.load %arg2[%c0_30, %c8, %c0_31, %c0_32] : memref<1x9x2x128xf32, #tpu.memory_space<vmem>>, vector<1x1x2x128xf32>
    %34 = vector.shape_cast %33 : vector<1x1x2x128xf32> to vector<2x128xf32>
    %35 = arith.maximumf %32, %34 : vector<2x128xf32>
    %cst = arith.constant 0.000000e+00 : f32
    %36 = vector.broadcast %cst : f32 to vector<2x128xf32>
    %cst_33 = arith.constant 0.000000e+00 : f32
    %37 = vector.broadcast %cst_33 : f32 to vector<2x128xf32>
    %cst_34 = arith.constant 0.000000e+00 : f32
    %38 = vector.broadcast %cst_34 : f32 to vector<2x128xf32>
    %c0_35 = arith.constant 0 : index
    %c0_36 = arith.constant 0 : index
    %c0_37 = arith.constant 0 : index
    %c0_38 = arith.constant 0 : index
    %39 = vector.load %arg2[%c0_35, %c0_36, %c0_37, %c0_38] : memref<1x9x2x128xf32, #tpu.memory_space<vmem>>, vector<1x1x2x128xf32>
    %40 = vector.shape_cast %39 : vector<1x1x2x128xf32> to vector<2x128xf32>
    %41 = arith.subf %40, %35 : vector<2x128xf32>
    %42 = math.exp %41 : vector<2x128xf32>
    %43 = arith.addf %36, %42 : vector<2x128xf32>
    %c0_i32_39 = arith.constant 0 : i32
    %44 = vector.broadcast %c0_i32_39 : i32 to vector<2x128xi32>
    %45 = arith.cmpi eq, %9, %44 : vector<2x128xi32>
    %46 = arith.select %45, %40, %37 : vector<2x128xi1>, vector<2x128xf32>
    %cst_40 = arith.constant 1.510500e+00 : f32
    %47 = vector.broadcast %cst_40 : f32 to vector<2x128xf32>
    %48 = arith.select %45, %47, %38 : vector<2x128xi1>, vector<2x128xf32>
    %c0_41 = arith.constant 0 : index
    %c1_42 = arith.constant 1 : index
    %c0_43 = arith.constant 0 : index
    %c0_44 = arith.constant 0 : index
    %49 = vector.load %arg2[%c0_41, %c1_42, %c0_43, %c0_44] : memref<1x9x2x128xf32, #tpu.memory_space<vmem>>, vector<1x1x2x128xf32>
    %50 = vector.shape_cast %49 : vector<1x1x2x128xf32> to vector<2x128xf32>
    %51 = arith.subf %50, %35 : vector<2x128xf32>
    %52 = math.exp %51 : vector<2x128xf32>
    %53 = arith.addf %43, %52 : vector<2x128xf32>
    %c1_i32_45 = arith.constant 1 : i32
    %54 = vector.broadcast %c1_i32_45 : i32 to vector<2x128xi32>
    %55 = arith.cmpi eq, %9, %54 : vector<2x128xi32>
    %56 = arith.select %55, %50, %46 : vector<2x128xi1>, vector<2x128xf32>
    %cst_46 = arith.constant 1.665910e+01 : f32
    %57 = vector.broadcast %cst_46 : f32 to vector<2x128xf32>
    %58 = arith.select %55, %57, %48 : vector<2x128xi1>, vector<2x128xf32>
    %c0_47 = arith.constant 0 : index
    %c2_48 = arith.constant 2 : index
    %c0_49 = arith.constant 0 : index
    %c0_50 = arith.constant 0 : index
    %59 = vector.load %arg2[%c0_47, %c2_48, %c0_49, %c0_50] : memref<1x9x2x128xf32, #tpu.memory_space<vmem>>, vector<1x1x2x128xf32>
    %60 = vector.shape_cast %59 : vector<1x1x2x128xf32> to vector<2x128xf32>
    %61 = arith.subf %60, %35 : vector<2x128xf32>
    %62 = math.exp %61 : vector<2x128xf32>
    %63 = arith.addf %53, %62 : vector<2x128xf32>
    %c2_i32 = arith.constant 2 : i32
    %64 = vector.broadcast %c2_i32 : i32 to vector<2x128xi32>
    %65 = arith.cmpi eq, %9, %64 : vector<2x128xi32>
    %66 = arith.select %65, %60, %56 : vector<2x128xi1>, vector<2x128xf32>
    %cst_51 = arith.constant 2.942380e+01 : f32
    %67 = vector.broadcast %cst_51 : f32 to vector<2x128xf32>
    %68 = arith.select %65, %67, %58 : vector<2x128xi1>, vector<2x128xf32>
    %c0_52 = arith.constant 0 : index
    %c3_53 = arith.constant 3 : index
    %c0_54 = arith.constant 0 : index
    %c0_55 = arith.constant 0 : index
    %69 = vector.load %arg2[%c0_52, %c3_53, %c0_54, %c0_55] : memref<1x9x2x128xf32, #tpu.memory_space<vmem>>, vector<1x1x2x128xf32>
    %70 = vector.shape_cast %69 : vector<1x1x2x128xf32> to vector<2x128xf32>
    %71 = arith.subf %70, %35 : vector<2x128xf32>
    %72 = math.exp %71 : vector<2x128xf32>
    %73 = arith.addf %63, %72 : vector<2x128xf32>
    %c3_i32 = arith.constant 3 : i32
    %74 = vector.broadcast %c3_i32 : i32 to vector<2x128xi32>
    %75 = arith.cmpi eq, %9, %74 : vector<2x128xi32>
    %76 = arith.select %75, %70, %66 : vector<2x128xi1>, vector<2x128xf32>
    %cst_56 = arith.constant 3.463150e+01 : f32
    %77 = vector.broadcast %cst_56 : f32 to vector<2x128xf32>
    %78 = arith.select %75, %77, %68 : vector<2x128xi1>, vector<2x128xf32>
    %c0_57 = arith.constant 0 : index
    %c4_58 = arith.constant 4 : index
    %c0_59 = arith.constant 0 : index
    %c0_60 = arith.constant 0 : index
    %79 = vector.load %arg2[%c0_57, %c4_58, %c0_59, %c0_60] : memref<1x9x2x128xf32, #tpu.memory_space<vmem>>, vector<1x1x2x128xf32>
    %80 = vector.shape_cast %79 : vector<1x1x2x128xf32> to vector<2x128xf32>
    %81 = arith.subf %80, %35 : vector<2x128xf32>
    %82 = math.exp %81 : vector<2x128xf32>
    %83 = arith.addf %73, %82 : vector<2x128xf32>
    %c4_i32 = arith.constant 4 : i32
    %84 = vector.broadcast %c4_i32 : i32 to vector<2x128xi32>
    %85 = arith.cmpi eq, %9, %84 : vector<2x128xi32>
    %86 = arith.select %85, %80, %76 : vector<2x128xi1>, vector<2x128xf32>
    %cst_61 = arith.constant 4.008450e+01 : f32
    %87 = vector.broadcast %cst_61 : f32 to vector<2x128xf32>
    %88 = arith.select %85, %87, %78 : vector<2x128xi1>, vector<2x128xf32>
    %c0_62 = arith.constant 0 : index
    %c5_63 = arith.constant 5 : index
    %c0_64 = arith.constant 0 : index
    %c0_65 = arith.constant 0 : index
    %89 = vector.load %arg2[%c0_62, %c5_63, %c0_64, %c0_65] : memref<1x9x2x128xf32, #tpu.memory_space<vmem>>, vector<1x1x2x128xf32>
    %90 = vector.shape_cast %89 : vector<1x1x2x128xf32> to vector<2x128xf32>
    %91 = arith.subf %90, %35 : vector<2x128xf32>
    %92 = math.exp %91 : vector<2x128xf32>
    %93 = arith.addf %83, %92 : vector<2x128xf32>
    %c5_i32 = arith.constant 5 : i32
    %94 = vector.broadcast %c5_i32 : i32 to vector<2x128xi32>
    %95 = arith.cmpi eq, %9, %94 : vector<2x128xi32>
    %96 = arith.select %95, %90, %86 : vector<2x128xi1>, vector<2x128xf32>
    %cst_66 = arith.constant 4.143570e+01 : f32
    %97 = vector.broadcast %cst_66 : f32 to vector<2x128xf32>
    %98 = arith.select %95, %97, %88 : vector<2x128xi1>, vector<2x128xf32>
    %c0_67 = arith.constant 0 : index
    %c6_68 = arith.constant 6 : index
    %c0_69 = arith.constant 0 : index
    %c0_70 = arith.constant 0 : index
    %99 = vector.load %arg2[%c0_67, %c6_68, %c0_69, %c0_70] : memref<1x9x2x128xf32, #tpu.memory_space<vmem>>, vector<1x1x2x128xf32>
    %100 = vector.shape_cast %99 : vector<1x1x2x128xf32> to vector<2x128xf32>
    %101 = arith.subf %100, %35 : vector<2x128xf32>
    %102 = math.exp %101 : vector<2x128xf32>
    %103 = arith.addf %93, %102 : vector<2x128xf32>
    %c6_i32 = arith.constant 6 : i32
    %104 = vector.broadcast %c6_i32 : i32 to vector<2x128xi32>
    %105 = arith.cmpi eq, %9, %104 : vector<2x128xi32>
    %106 = arith.select %105, %100, %96 : vector<2x128xi1>, vector<2x128xf32>
    %cst_71 = arith.constant 4.797940e+01 : f32
    %107 = vector.broadcast %cst_71 : f32 to vector<2x128xf32>
    %108 = arith.select %105, %107, %98 : vector<2x128xi1>, vector<2x128xf32>
    %c0_72 = arith.constant 0 : index
    %c7_73 = arith.constant 7 : index
    %c0_74 = arith.constant 0 : index
    %c0_75 = arith.constant 0 : index
    %109 = vector.load %arg2[%c0_72, %c7_73, %c0_74, %c0_75] : memref<1x9x2x128xf32, #tpu.memory_space<vmem>>, vector<1x1x2x128xf32>
    %110 = vector.shape_cast %109 : vector<1x1x2x128xf32> to vector<2x128xf32>
    %111 = arith.subf %110, %35 : vector<2x128xf32>
    %112 = math.exp %111 : vector<2x128xf32>
    %113 = arith.addf %103, %112 : vector<2x128xf32>
    %c7_i32 = arith.constant 7 : i32
    %114 = vector.broadcast %c7_i32 : i32 to vector<2x128xi32>
    %115 = arith.cmpi eq, %9, %114 : vector<2x128xi32>
    %116 = arith.select %115, %110, %106 : vector<2x128xi1>, vector<2x128xf32>
    %cst_76 = arith.constant 4.537250e+01 : f32
    %117 = vector.broadcast %cst_76 : f32 to vector<2x128xf32>
    %118 = arith.select %115, %117, %108 : vector<2x128xi1>, vector<2x128xf32>
    %c0_77 = arith.constant 0 : index
    %c8_78 = arith.constant 8 : index
    %c0_79 = arith.constant 0 : index
    %c0_80 = arith.constant 0 : index
    %119 = vector.load %arg2[%c0_77, %c8_78, %c0_79, %c0_80] : memref<1x9x2x128xf32, #tpu.memory_space<vmem>>, vector<1x1x2x128xf32>
    %120 = vector.shape_cast %119 : vector<1x1x2x128xf32> to vector<2x128xf32>
    %121 = arith.subf %120, %35 : vector<2x128xf32>
    %122 = math.exp %121 : vector<2x128xf32>
    %123 = arith.addf %113, %122 : vector<2x128xf32>
    %c8_i32 = arith.constant 8 : i32
    %124 = vector.broadcast %c8_i32 : i32 to vector<2x128xi32>
    %125 = arith.cmpi eq, %9, %124 : vector<2x128xi32>
    %126 = arith.select %125, %120, %116 : vector<2x128xi1>, vector<2x128xf32>
    %cst_81 = arith.constant 4.490000e+01 : f32
    %127 = vector.broadcast %cst_81 : f32 to vector<2x128xf32>
    %128 = arith.select %125, %127, %118 : vector<2x128xi1>, vector<2x128xf32>
    %129 = math.log %123 : vector<2x128xf32>
    %130 = arith.addf %129, %35 : vector<2x128xf32>
    %131 = arith.subf %130, %126 : vector<2x128xf32>
    %c0_82 = arith.constant 0 : index
    %c0_83 = arith.constant 0 : index
    %132 = vector.load %arg7[%c0_82, %c0_83] : memref<2x128xf32, #tpu.memory_space<vmem>>, vector<2x128xf32>
    %133 = arith.mulf %128, %131 : vector<2x128xf32>
    %134 = arith.addf %132, %133 : vector<2x128xf32>
    %c0_84 = arith.constant 0 : index
    %c0_85 = arith.constant 0 : index
    %135 = vector.load %arg7[%c0_84, %c0_85] : memref<2x128xf32, #tpu.memory_space<vmem>>, vector<2x128xf32>
    tpu.vector_store %arg7[%c0_84, %c0_85], %134 {strides = array<i32>} : memref<2x128xf32, #tpu.memory_space<vmem>>, vector<2x128xf32>,
    %c0_86 = arith.constant 0 : index
    %c0_87 = arith.constant 0 : index
    %136 = vector.load %arg8[%c0_86, %c0_87] : memref<2x128xf32, #tpu.memory_space<vmem>>, vector<2x128xf32>
    %137 = arith.addf %136, %128 : vector<2x128xf32>
    %c0_88 = arith.constant 0 : index
    %c0_89 = arith.constant 0 : index
    %138 = vector.load %arg8[%c0_88, %c0_89] : memref<2x128xf32, #tpu.memory_space<vmem>>, vector<2x128xf32>
    tpu.vector_store %arg8[%c0_88, %c0_89], %137 {strides = array<i32>} : memref<2x128xf32, #tpu.memory_space<vmem>>, vector<2x128xf32>,
    %c0_90 = arith.constant 0 : index
    %c0_91 = arith.constant 0 : index
    %c0_92 = arith.constant 0 : index
    %139 = vector.load %arg5[%c0_90, %c0_91, %c0_92] : memref<1x2x128xi32, #tpu.memory_space<vmem>>, vector<1x2x128xi32>
    %140 = vector.shape_cast %139 : vector<1x2x128xi32> to vector<2x128xi32>
    %c0_93 = arith.constant 0 : index
    %c0_94 = arith.constant 0 : index
    %c0_95 = arith.constant 0 : index
    %c0_96 = arith.constant 0 : index
    %141 = vector.load %arg3[%c0_93, %c0_94, %c0_95, %c0_96] : memref<1x2x2x128xf32, #tpu.memory_space<vmem>>, vector<1x1x2x128xf32>
    %142 = vector.shape_cast %141 : vector<1x1x2x128xf32> to vector<2x128xf32>
    %c0_97 = arith.constant 0 : index
    %c1_98 = arith.constant 1 : index
    %c0_99 = arith.constant 0 : index
    %c0_100 = arith.constant 0 : index
    %143 = vector.load %arg3[%c0_97, %c1_98, %c0_99, %c0_100] : memref<1x2x2x128xf32, #tpu.memory_space<vmem>>, vector<1x1x2x128xf32>
    %144 = vector.shape_cast %143 : vector<1x1x2x128xf32> to vector<2x128xf32>
    %145 = arith.maximumf %142, %144 : vector<2x128xf32>
    %cst_101 = arith.constant 0.000000e+00 : f32
    %146 = vector.broadcast %cst_101 : f32 to vector<2x128xf32>
    %cst_102 = arith.constant 0.000000e+00 : f32
    %147 = vector.broadcast %cst_102 : f32 to vector<2x128xf32>
    %cst_103 = arith.constant 0.000000e+00 : f32
    %148 = vector.broadcast %cst_103 : f32 to vector<2x128xf32>
    %c0_104 = arith.constant 0 : index
    %c0_105 = arith.constant 0 : index
    %c0_106 = arith.constant 0 : index
    %c0_107 = arith.constant 0 : index
    %149 = vector.load %arg3[%c0_104, %c0_105, %c0_106, %c0_107] : memref<1x2x2x128xf32, #tpu.memory_space<vmem>>, vector<1x1x2x128xf32>
    %150 = vector.shape_cast %149 : vector<1x1x2x128xf32> to vector<2x128xf32>
    %151 = arith.subf %150, %145 : vector<2x128xf32>
    %152 = math.exp %151 : vector<2x128xf32>
    %153 = arith.addf %146, %152 : vector<2x128xf32>
    %c0_i32_108 = arith.constant 0 : i32
    %154 = vector.broadcast %c0_i32_108 : i32 to vector<2x128xi32>
    %155 = arith.cmpi eq, %140, %154 : vector<2x128xi32>
    %156 = arith.select %155, %150, %147 : vector<2x128xi1>, vector<2x128xf32>
    %cst_109 = arith.constant 1.512100e+00 : f32
    %157 = vector.broadcast %cst_109 : f32 to vector<2x128xf32>
    %158 = arith.select %155, %157, %148 : vector<2x128xi1>, vector<2x128xf32>
    %c0_110 = arith.constant 0 : index
    %c1_111 = arith.constant 1 : index
    %c0_112 = arith.constant 0 : index
    %c0_113 = arith.constant 0 : index
    %159 = vector.load %arg3[%c0_110, %c1_111, %c0_112, %c0_113] : memref<1x2x2x128xf32, #tpu.memory_space<vmem>>, vector<1x1x2x128xf32>
    %160 = vector.shape_cast %159 : vector<1x1x2x128xf32> to vector<2x128xf32>
    %161 = arith.subf %160, %145 : vector<2x128xf32>
    %162 = math.exp %161 : vector<2x128xf32>
    %163 = arith.addf %153, %162 : vector<2x128xf32>
    %c1_i32_114 = arith.constant 1 : i32
    %164 = vector.broadcast %c1_i32_114 : i32 to vector<2x128xi32>
    %165 = arith.cmpi eq, %140, %164 : vector<2x128xi32>
    %166 = arith.select %165, %160, %156 : vector<2x128xi1>, vector<2x128xf32>
    %cst_115 = arith.constant 1.023880e+01 : f32
    %167 = vector.broadcast %cst_115 : f32 to vector<2x128xf32>
    %168 = arith.select %165, %167, %158 : vector<2x128xi1>, vector<2x128xf32>
    %169 = math.log %163 : vector<2x128xf32>
    %170 = arith.addf %169, %145 : vector<2x128xf32>
    %171 = arith.subf %170, %166 : vector<2x128xf32>
    %c0_116 = arith.constant 0 : index
    %c0_117 = arith.constant 0 : index
    %172 = vector.load %arg9[%c0_116, %c0_117] : memref<2x128xf32, #tpu.memory_space<vmem>>, vector<2x128xf32>
    %173 = arith.mulf %168, %171 : vector<2x128xf32>
    %174 = arith.addf %172, %173 : vector<2x128xf32>
    %c0_118 = arith.constant 0 : index
    %c0_119 = arith.constant 0 : index
    %175 = vector.load %arg9[%c0_118, %c0_119] : memref<2x128xf32, #tpu.memory_space<vmem>>, vector<2x128xf32>
    tpu.vector_store %arg9[%c0_118, %c0_119], %174 {strides = array<i32>} : memref<2x128xf32, #tpu.memory_space<vmem>>, vector<2x128xf32>,
    %c0_120 = arith.constant 0 : index
    %c0_121 = arith.constant 0 : index
    %176 = vector.load %arg10[%c0_120, %c0_121] : memref<2x128xf32, #tpu.memory_space<vmem>>, vector<2x128xf32>
    %177 = arith.addf %176, %168 : vector<2x128xf32>
    %c0_122 = arith.constant 0 : index
    %c0_123 = arith.constant 0 : index
    %178 = vector.load %arg10[%c0_122, %c0_123] : memref<2x128xf32, #tpu.memory_space<vmem>>, vector<2x128xf32>
    tpu.vector_store %arg10[%c0_122, %c0_123], %177 {strides = array<i32>} : memref<2x128xf32, #tpu.memory_space<vmem>>, vector<2x128xf32>,
    %179 = arith.extui %5 : i1 to i32
    %c0_i32_124 = arith.constant 0 : i32
    %180 = arith.cmpi ne, %179, %c0_i32_124 : i32
    scf.if %180 {
      %c0_125 = arith.constant 0 : index
      %c0_126 = arith.constant 0 : index
      %181 = vector.load %arg7[%c0_125, %c0_126] : memref<2x128xf32, #tpu.memory_space<vmem>>, vector<2x128xf32>
      %182 = vector.shape_cast %181 : vector<2x128xf32> to vector<1x2x128xf32>
      %cst_127 = arith.constant dense<0.000000e+00> : vector<1xf32>
      %183 = vector.multi_reduction <add>, %182, %cst_127 [1, 2] : vector<1x2x128xf32> to vector<1xf32>
      %184 = vector.shape_cast %183 : vector<1xf32> to vector<1x1x1xf32>
      %185 = vector.extract %184[0, 0, 0] : f32 from vector<1x1x1xf32>
      %c0_128 = arith.constant 0 : index
      %186 = memref.load %arg6[%c0_128] : memref<4xf32, #tpu.memory_space<smem>>
      memref.store %185, %arg6[%c0_128] : memref<4xf32, #tpu.memory_space<smem>>
      %c0_129 = arith.constant 0 : index
      %c0_130 = arith.constant 0 : index
      %187 = vector.load %arg8[%c0_129, %c0_130] : memref<2x128xf32, #tpu.memory_space<vmem>>, vector<2x128xf32>
      %188 = vector.shape_cast %187 : vector<2x128xf32> to vector<1x2x128xf32>
      %cst_131 = arith.constant dense<0.000000e+00> : vector<1xf32>
      %189 = vector.multi_reduction <add>, %188, %cst_131 [1, 2] : vector<1x2x128xf32> to vector<1xf32>
      %190 = vector.shape_cast %189 : vector<1xf32> to vector<1x1x1xf32>
      %191 = vector.extract %190[0, 0, 0] : f32 from vector<1x1x1xf32>
      %c1_132 = arith.constant 1 : index
      %192 = memref.load %arg6[%c1_132] : memref<4xf32, #tpu.memory_space<smem>>
      memref.store %191, %arg6[%c1_132] : memref<4xf32, #tpu.memory_space<smem>>
      %c0_133 = arith.constant 0 : index
      %c0_134 = arith.constant 0 : index
      %193 = vector.load %arg9[%c0_133, %c0_134] : memref<2x128xf32, #tpu.memory_space<vmem>>, vector<2x128xf32>
      %194 = vector.shape_cast %193 : vector<2x128xf32> to vector<1x2x128xf32>
      %cst_135 = arith.constant dense<0.000000e+00> : vector<1xf32>
      %195 = vector.multi_reduction <add>, %194, %cst_135 [1, 2] : vector<1x2x128xf32> to vector<1xf32>
      %196 = vector.shape_cast %195 : vector<1xf32> to vector<1x1x1xf32>
      %197 = vector.extract %196[0, 0, 0] : f32 from vector<1x1x1xf32>
      %c2_136 = arith.constant 2 : index
      %198 = memref.load %arg6[%c2_136] : memref<4xf32, #tpu.memory_space<smem>>
      memref.store %197, %arg6[%c2_136] : memref<4xf32, #tpu.memory_space<smem>>
      %c0_137 = arith.constant 0 : index
      %c0_138 = arith.constant 0 : index
      %199 = vector.load %arg10[%c0_137, %c0_138] : memref<2x128xf32, #tpu.memory_space<vmem>>, vector<2x128xf32>
      %200 = vector.shape_cast %199 : vector<2x128xf32> to vector<1x2x128xf32>
      %cst_139 = arith.constant dense<0.000000e+00> : vector<1xf32>
      %201 = vector.multi_reduction <add>, %200, %cst_139 [1, 2] : vector<1x2x128xf32> to vector<1xf32>
      %202 = vector.shape_cast %201 : vector<1xf32> to vector<1x1x1xf32>
      %203 = vector.extract %202[0, 0, 0] : f32 from vector<1x1x1xf32>
      %c3_140 = arith.constant 3 : index
      %204 = memref.load %arg6[%c3_140] : memref<4xf32, #tpu.memory_space<smem>>
      memref.store %203, %arg6[%c3_140] : memref<4xf32, #tpu.memory_space<smem>>
    } else {
    }
    return
  }
  func.func @transform_0(%arg0: i32, %arg1: i32) -> (i32, i32, i32, i32) {
    %c0_i32 = arith.constant 0 : i32
    %c0_i32_0 = arith.constant 0 : i32
    %c0_i32_1 = arith.constant 0 : i32
    return %arg0, %c0_i32, %arg1, %c0_i32_0 : i32, i32, i32, i32
  }
  func.func @transform_1(%arg0: i32, %arg1: i32) -> (i32, i32, i32, i32) {
    %c0_i32 = arith.constant 0 : i32
    %c0_i32_0 = arith.constant 0 : i32
    %c0_i32_1 = arith.constant 0 : i32
    return %arg0, %c0_i32, %arg1, %c0_i32_0 : i32, i32, i32, i32
  }
  func.func @transform_2(%arg0: i32, %arg1: i32) -> (i32, i32, i32) {
    %c0_i32 = arith.constant 0 : i32
    %c0_i32_0 = arith.constant 0 : i32
    return %arg0, %arg1, %c0_i32 : i32, i32, i32
  }
  func.func @transform_3(%arg0: i32, %arg1: i32) -> (i32, i32, i32) {
    %c0_i32 = arith.constant 0 : i32
    %c0_i32_0 = arith.constant 0 : i32
    return %arg0, %arg1, %c0_i32 : i32, i32, i32
  }
  func.func @transform_4(%arg0: i32, %arg1: i32) -> i32 {
    %c0_i32 = arith.constant 0 : i32
    %c0_i32_0 = arith.constant 0 : i32
    return %c0_i32 : i32
  }
}

</mosaic_0001>

<bundles_post_ra>
// kernel: eeemodel_loss_forward.1
= control target key start
LH: loop header
LB: loop body
LE: loop exit
PB: predicated region body
PF: predicated region fallthrough
CT: control target
= control target key end

     0   :  { %9 = vsyncpa [#allocation7], 0  ;;  %s767_s15 = smov 0   ;;  %s769_s16 = smov 0   ;;  %s989_s0 = inlined_call_operand.vmem [shape: f32[2,9,2,128], index: 0, kind: input, shape index: {}]   ;;  %s990_s1 = inlined_call_operand.vmem [shape: f32[2,2,2,128], index: 1, kind: input, shape index: {}]   ;;  %s991_s2 = inlined_call_operand.vmem [shape: s32[2,2,128], index: 2, kind: input, shape index: {}]   ;;  %s992_s3 = inlined_call_operand.vmem [shape: s32[2,2,128], index: 3, kind: input, shape index: {}]   ;;  %s993_s4 = inlined_call_operand.vmem [shape: f32[4], index: 4, kind: output, shape index: {}]  }
   0x1   :  { %s771_s17 = smov 0  }
   0x2 LB: > { %s602_s18 = sadd.s32 4294967295, %s737_s17   ;;  %s27_s19 = sadd.s32 1, %s733_s16  ;;  %s737_s17 = sphi %s771_s17, %s15_s17   ;;  %s733_s16 = sphi %s769_s16, %s996_s16   ;;  %s729_s15 = sphi %s767_s15, %s995_s15  }
   0x3   : > { %p29_p0 = scmp.ge.s32.totalorder %s27_s19, 2  ;;  %p605_p1 = scmp.ge.s32.totalorder %s737_s17, 1 }
   0x4   : > { %p218_p2 = scmp.lt.s32.totalorder %s737_s17, 3 }
   0x5   : > { %s998_s19 = smov (%p29_p0, %s27_s19), 0 }
   0x6   : > { %p219_p3 = pnand %p605_p1, %p218_p2 }
   0x7   : > { %p264_p4 = scmp.lt.s32.totalorder (!%p219_p3), %s729_s15, 1  ;;  %p294_p5 = scmp.eq.s32.totalorder (!%p219_p3), %s729_s15, 0 }
   0x8   : > { %222 = sbr.rel (%p219_p3) target bundleno = 330 (0x14a), region = 36  ;;  %p298_p6 = scmp.eq.s32.totalorder (!%p219_p3), %s729_s15, 1 }
   0xf   : > { %s265_s20 = scalar_select %p264_p4, %s729_s15, 1 }
  0x10   : > { %302 = sbr.rel (!%p294_p5) target bundleno = 23 (0x17), region = 40  ;;  %v739_v0 = vmov (%p294_p5), 0.0  }
  0x11   : > { %s629_s21 = smul.u32 18, %s265_s20  ;;  %s626_s22 = sshll.u32 %s265_s20, 2  ;;  %303 = vst [vmem:[#allocation2] sm:$0x3] (%p294_p5), %v739_v0  ;;  %304 = vst [vmem:[#allocation3] sm:$0x3] (%p294_p5), %v739_v0 }
  0x12   : > { %s795_s25 = scalar_lea.vmem %s990_s1, %s626_s22  ;;  %s609_s26 = sshll.u32 %s265_s20, 1  ;;  %305 = vst [vmem:[#allocation4] sm:$0x3] (%p294_p5), %v739_v0  ;;  %306 = vst [vmem:[#allocation5] sm:$0x3] (%p294_p5), %v739_v0 }
  0x13   : > { %s800_s29 = scalar_lea.vmem %s989_s0, %s629_s21  ;;  %s286_s6 = scalar_lea.vmem %s991_s2, %s609_s26 }
  0x14   : > { %s808_s9 = scalar_lea.vmem %s992_s3, %s609_s26 }
  0x17 PF: > { %v810_v1 = vld [vmem:[%s286_s6] sm:$0x3]  ;;  %v816_v3 = vld [vmem:[%s800_s29 + $0x2] sm:$0x3]  ;;  %v821_v5 = vld [vmem:[%s800_s29 + $0x4] sm:$0x3] }
  0x18   : > { %v813_v2 = vld [vmem:[%s800_s29] sm:$0x3]  ;;  %v824_v6 = vld [vmem:[%s800_s29 + $0x6] sm:$0x3]  ;;  %vm337_vm0 = vcmp.eq.s32.totalorder %v810_v1, 0  ;;  %v740_v9 = vmov 0.0  }
  0x19   : > { %v311_v4 = vmax.f32 %v813_v2, %v816_v3  ;;  %v829_v8 = vld [vmem:[%s800_s29 + $0x8] sm:$0x3]  ;;  %v339_v10 = vsel %vm337_vm0, 1.5105, %v740_v9  ;;  %vm344_vm1 = vcmp.eq.s32.totalorder %v810_v1, 1  ;;  %vm351_vm2 = vcmp.eq.s32.totalorder %v810_v1, 2 }
  0x1a   : > { %v836_v12 = vld [vmem:[%s800_s29 + $0xa] sm:$0x3]  ;;  %v346_v13 = vsel %vm344_vm1, 16.6591, %v339_v10  ;;  %v842_v14 = vld [vmem:[%s800_s29 + $0xc] sm:$0x3] }
  0x1b   : > { %v314_v7 = vmax.f32 %v311_v4, %v821_v5  ;;  %v353_v15 = vsel %vm351_vm2, 29.4238, %v346_v13  ;;  %vm358_vm3 = vcmp.eq.s32.totalorder %v810_v1, 3  ;;  %vm365_vm4 = vcmp.eq.s32.totalorder %v810_v1, 4  ;;  %v853_v18 = vld [vmem:[%s808_s9] sm:$0x3] }
  0x1c   : > { %v360_v17 = vsel %vm358_vm3, 34.6315, %v353_v15  ;;  %vm372_vm5 = vcmp.eq.s32.totalorder %v810_v1, 5  ;;  %v856_v19 = vld [vmem:[%s800_s29 + $0xe] sm:$0x3]  ;;  %vm379_vm6 = vcmp.eq.s32.totalorder %v810_v1, 6 }
  0x1d   : > { %v317_v11 = vmax.f32 %v314_v7, %v824_v6  ;;  %v367_v20 = vsel %vm365_vm4, 40.0845, %v360_v17  ;;  %v404_v21 = vld [vmem:[#allocation3] sm:$0x3]  ;;  %v861_v22 = vld [vmem:[%s795_s25] sm:$0x3] }
  0x1e   : > { %v374_v24 = vsel %vm372_vm5, 41.4357, %v367_v20  ;;  %v868_v25 = vld [vmem:[%s795_s25 + $0x2] sm:$0x3]  ;;  %vm416_vm7 = vcmp.eq.s32.totalorder %v853_v18, 0  ;;  %vm386_vm8 = vcmp.eq.s32.totalorder %v810_v1, 7 }
  0x1f   : > { %v320_v16 = vmax.f32 %v317_v11, %v829_v8  ;;  %v381_v26 = vsel %vm379_vm6, 47.9794, %v374_v24  ;;  %v876_v27 = vmax.f32 %v861_v22, %v868_v25  ;;  %v418_v28 = vsel %vm416_vm7, 1.5121, %v740_v9  ;;  %v434_v31 = vld [vmem:[#allocation5] sm:$0x3] }
  0x20   : > { %v388_v30 = vsel %vm386_vm8, 45.3725, %v381_v26  ;;  %vm393_vm9 = vcmp.eq.s32.totalorder %v810_v1, 8  ;;  %v885_v32 = vld [vmem:[%s800_s29 + $0x10] sm:$0x3]  ;;  %vm423_vm10 = vcmp.eq.s32.totalorder %v853_v18, 1 }
  0x21   : > { %v323_v23 = vmax.f32 %v320_v16, %v836_v12  ;;  %v889_v33 = vsel %vm393_vm9, 44.9, %v388_v30  ;;  %v412_v34 = vsub.f32 %v861_v22, %v876_v27  ;;  %v419_v35 = vsub.f32 %v868_v25, %v876_v27 }
  0x22   : > { %v405_v37 = vadd.f32 %v404_v21, %v889_v33  ;;  %v900_v38 = vsel %vm423_vm10, 10.2388, %v418_v28  ;;  %v338_v15 = vsel %vm337_vm0, %v813_v2, 0.0  ;;  %v417_v28 = vsel %vm416_vm7, %v861_v22, 0.0 }
  0x23   : > { %v326_v29 = vmax.f32 %v323_v23, %v842_v14  ;;  %v413_v39 = vmul.f32 1.442695, %v412_v34  ;;  %v435_v40 = vadd.f32 %v434_v31, %v900_v38  ;;  %v420_v42 = vmul.f32 1.442695, %v419_v35 }
  0x24   : > { %406 = vst [vmem:[#allocation3] sm:$0x3] %v405_v37  ;;  %v345_v23 = vsel %vm344_vm1, %v816_v3, %v338_v15  ;;  %vm440_vm11 = vcmask (%p298_p6), 1041408  }
  0x25   : > { %v329_v36 = vmax.f32 %v326_v29, %v856_v19  ;;  %436 = vst [vmem:[#allocation5] sm:$0x3] %v435_v40  ;;  %671 = vpow2.f32 %v413_v39  ;;  %v352_v30 = vsel %vm351_vm2, %v821_v5, %v345_v23  ;;  %v430_v40 = vld [vmem:[#allocation4] sm:$0x3] }
  0x26   : > { %673 = vpow2.f32 %v420_v42 }
  0x27   : > { %v904_v41 = vmax.f32 %v329_v36, %v885_v32  ;;  %v424_v36 = vsel %vm423_vm10, %v868_v25, %v417_v28 }
  0x29   : > { %v333_v43 = vsub.f32 %v813_v2, %v904_v41  ;;  %v340_v44 = vsub.f32 %v816_v3, %v904_v41  ;;  %v347_v45 = vsub.f32 %v821_v5, %v904_v41  ;;  %v354_v46 = vsub.f32 %v824_v6, %v904_v41 }
  0x2a   : > { %v361_v47 = vsub.f32 %v829_v8, %v904_v41  ;;  %v368_v52 = vsub.f32 %v836_v12, %v904_v41  ;;  %v375_v54 = vsub.f32 %v842_v14, %v904_v41  ;;  %v382_v56 = vsub.f32 %v856_v19, %v904_v41 }
  0x2b   : > { %v334_v48 = vmul.f32 1.442695, %v333_v43  ;;  %v341_v49 = vmul.f32 1.442695, %v340_v44  ;;  %v348_v50 = vmul.f32 1.442695, %v347_v45  ;;  %v389_v58 = vsub.f32 %v885_v32, %v904_v41 }
  0x2c   : > { %v355_v51 = vmul.f32 1.442695, %v354_v46  ;;  %v362_v53 = vmul.f32 1.442695, %v361_v47  ;;  %v369_v55 = vmul.f32 1.442695, %v368_v52  ;;  %v359_v3 = vsel %vm358_vm3, %v824_v6, %v352_v30 }
  0x2d   : > { %675 = vpow2.f32 %v334_v48  ;;  %v376_v57 = vmul.f32 1.442695, %v375_v54  ;;  %v383_v60 = vmul.f32 1.442695, %v382_v56  ;;  %v390_v62 = vmul.f32 1.442695, %v389_v58 }
  0x2e   : > { %677 = vpow2.f32 %v341_v49  ;;  %v366_v5 = vsel %vm365_vm4, %v829_v8, %v359_v3 }
  0x2f   : > { %679 = vpow2.f32 %v348_v50  ;;  %v672_v59 = vpop.eup %671  ;;  %v373_v18 = vsel %vm372_vm5, %v836_v12, %v366_v5  ;;  %v400_v12 = vld [vmem:[#allocation2] sm:$0x3]  ;;  %v479_v50 = vld [vmem:[#allocation5] sm:$0x3] (%p298_p6) }
  0x30   : > { %681 = vpow2.f32 %v355_v51  ;;  %v674_v61 = vpop.eup %673  ;;  %v380_v6 = vsel %vm379_vm6, %v842_v14, %v373_v18  ;;  %v453_v51 = vld [vmem:[#allocation3] sm:$0x3] (%p298_p6)  ;;  %v480_v1 = vsel (%p298_p6), %vm440_vm11, %v479_v50, 0.0 }
  0x31   : > { %683 = vpow2.f32 %v362_v53  ;;  %v422_v0 = vadd.f32 %v674_v61, %v672_v59 }
  0x32   : > { %685 = vpow2.f32 %v369_v55 }
  0x33   : > { %687 = vpow2.f32 %v376_v57 }
  0x34   : > { %689 = vpow2.f32 %v383_v60 }
  0x35   : > { %691 = vlog2.f32 %v422_v0 }
  0x36   : > { %693 = vpow2.f32 %v390_v62 }
  0x37   : > { %v676_v63 = vpop.eup %675 }
  0x38   : > { %v678_v4 = vpop.eup %677 }
  0x39   : > { %v680_v7 = vpop.eup %679  ;;  %v343_v9 = vadd.f32 %v678_v4, %v676_v63 }
  0x3a   : > { %v682_v10 = vpop.eup %681 }
  0x3b   : > { %v350_v11 = vadd.f32 %v680_v7, %v343_v9  ;;  %v684_v13 = vpop.eup %683 }
  0x3c   : > { %v686_v17 = vpop.eup %685 }
  0x3d   : > { %v357_v16 = vadd.f32 %v682_v10, %v350_v11  ;;  %v688_v21 = vpop.eup %687 }
  0x3e   : > { %v690_v26 = vpop.eup %689 }
  0x3f   : > { %v364_v20 = vadd.f32 %v684_v13, %v357_v16  ;;  %v692_v29 = vpop.eup %691 }
  0x40   : > { %v694_v31 = vpop.eup %693  ;;  %v427_v34 = vmul.f32 0.6931472, %v692_v29 }
  0x41   : > { %v371_v24 = vadd.f32 %v686_v17, %v364_v20 }
  0x42   : > { %v428_v37 = vadd.f32 %v427_v34, %v876_v27  ;;  %v387_v27 = vsel %vm386_vm8, %v856_v19, %v380_v6 }
  0x43   : > { %v378_v2 = vadd.f32 %v688_v21, %v371_v24 }
  0x44   : > { %v429_v39 = vsub.f32 %v428_v37, %v424_v36 }
  0x45   : > { %v385_v35 = vadd.f32 %v690_v26, %v378_v2 }
  0x46   : > { %v431_v42 = vmul.f32 %v429_v39, %v900_v38  ;;  %v394_v38 = vsel %vm393_vm9, %v885_v32, %v387_v27  ;;  %v454_v32 = vsel (%p298_p6), %vm440_vm11, %v453_v51, 0.0 }
  0x47   : > { %v392_v22 = vadd.f32 %v694_v31, %v385_v35 }
  0x48   : > { %v432_v25 = vadd.f32 %v431_v42, %v430_v40 }
  0x49   : > { %695 = vlog2.f32 %v392_v22 }
  0x4a   : > { %433 = vst [vmem:[#allocation4] sm:$0x3] %v432_v25 }
  0x51   : > { %v466_v14 = vld [vmem:[#allocation4] sm:$0x3] (%p298_p6) }
  0x52   : > { %v467_v48 = vsel (%p298_p6), %vm440_vm11, %v466_v14, 0.0 }
  0x53   : > { %v696_v43 = vpop.eup %695  ;;  %468 = vadd.xlane.f32.xlu1 (%p298_p6), %v467_v48 }
  0x54   : > { %v397_v8 = vmul.f32 0.6931472, %v696_v43 }
  0x56   : > { %v398_v44 = vadd.f32 %v397_v8, %v904_v41 }
  0x57   : > { %481 = vadd.xlane.f32.xlu1 (%p298_p6), %v480_v1 }
  0x58   : > { %v399_v45 = vsub.f32 %v398_v44, %v394_v38  ;;  %438 = sbr.rel (!%p298_p6) target bundleno = 314 (0x13a), region = 44 }
  0x5a   : > { %v401_v46 = vmul.f32 %v399_v45, %v889_v33 }
  0x5c   : > { %v402_v47 = vadd.f32 %v401_v46, %v400_v12 }
  0x5e   : > { %403 = vst [vmem:[#allocation2] sm:$0x3] %v402_v47 }
  0x65   : > { %v439_v19 = vld [vmem:[#allocation2] sm:$0x3] }
  0x66   : > { %v441_v49 = vsel %vm440_vm11, %v439_v19, 0.0 }
  0x67   : > { %442 = vadd.xlane.f32.xlu0 %v441_v49 }
  0x6b   : > { %455 = vadd.xlane.f32.xlu0 %v454_v32 }
  0xe0   : > { %v469_v41 = vpop.xlane.xlu1 %468 }
  0xe1   : > { %v470_v52 = vrot.slane %v469_v41, 4 }
  0xe3   : > { %v471_v54 = vadd.f32 %v470_v52, %v469_v41 }
  0xe4   : > { %v482_v56 = vpop.xlane.xlu1 %481 }
  0xe5   : > { %v472_v58 = vrot.slane %v471_v54, 2  ;;  %v483_v60 = vrot.slane %v482_v56, 4 }
  0xe7   : > { %v484_v62 = vadd.f32 %v483_v60, %v482_v56  ;;  %v473_v4 = vadd.f32 %v472_v58, %v471_v54 }
  0xe9   : > { %v485_v7 = vrot.slane %v484_v62, 2  ;;  %v474_v16 = vrot.slane %v473_v4, 1 }
  0xeb   : > { %v486_v11 = vadd.f32 %v485_v7, %v484_v62  ;;  %v475_v24 = vadd.f32 %v474_v16, %v473_v4 }
  0xed   : > { %v487_v20 = vrot.slane %v486_v11, 1 }
  0xef   : > { %v488_v23 = vadd.f32 %v487_v20, %v486_v11 }
  0xf4   : > { %v443_v33 = vpop.xlane.xlu0 %442 }
  0xf5   : > { %v444_v53 = vrot.slane %v443_v33, 4 }
  0xf7   : > { %v445_v55 = vadd.f32 %v444_v53, %v443_v33 }
  0xf8   : > { %v456_v57 = vpop.xlane.xlu0 %455 }
  0xf9   : > { %v446_v59 = vrot.slane %v445_v55, 2  ;;  %v457_v61 = vrot.slane %v456_v57, 4 }
  0xfb   : > { %v458_v63 = vadd.f32 %v457_v61, %v456_v57  ;;  %v447_v0 = vadd.f32 %v446_v59, %v445_v55 }
  0xfd   : > { %v459_v9 = vrot.slane %v458_v63, 2  ;;  %v448_v10 = vrot.slane %v447_v0, 1 }
  0xff   : > { %v460_v13 = vadd.f32 %v459_v9, %v458_v63  ;;  %v449_v15 = vadd.f32 %v448_v10, %v447_v0 }
 0x101   : > { %630 = vpush %v449_v15  ;;  %v461_v17 = vrot.slane %v460_v13, 1 }
 0x103   : > { %v462_v21 = vadd.f32 %v461_v17, %v460_v13 }
 0x105   : > { %632 = vpush %v462_v21 }
 0x106   : > { %634 = vpush %v475_v24 }
 0x107   : > { %636 = vpush %v488_v23 }
 0x132   : > { %s631_s10 = spop %630 }
 0x133   : > { %452 = sst [smem:[#allocation6]] %s631_s10 }
 0x136   : > { %s633_s11 = spop %632 }
 0x137   : > { %465 = sst [smem:[#allocation6 + $0x1]] %s633_s11  ;;  %s635_s12 = spop %634 }
 0x138   : > { %478 = sst [smem:[#allocation6 + $0x2]] %s635_s12  ;;  %s637_s13 = spop %636 }
 0x139   : > { %491 = sst [smem:[#allocation6 + $0x3]] %s637_s13 }
 0x13a PF: > { %p965_p7 = scmp.eq.s32.totalorder %s602_s18, 1  ;;  %s499_s21 = sshll.u32 %s993_s4, 4  ;;  %s500_s21 = int_to_ptr.vmem [resolvable:$true] %s499_s21 }
 0x13b   : > { %s697_s22 = scalar_lea.vmem %s500_s21, 16  ;;  %p704_p11 = scmp.lt.s32.totalorder %s500_s21, %s500_s21 }
 0x13c   : > { %p698_p8 = scmp.ne.s32.totalorder %s500_s21, %s697_s22  ;;  %p705_p12 = scmp.lt.s32.totalorder %s697_s22, %s697_s22 }
 0x13e   : > { %p699_p9 = pnand %p698_p8, %p965_p7  ;;  %p706_p13 = por %p705_p12, %p704_p11 }
 0x140   : > { %p700_p10 = pneg %p699_p9 }
 0x142   : > { %p707_p0 = pnand %p706_p13, %p700_p10 }
 0x144   : > { %710 = shalt.err (!%p707_p0)
}
 0x145   : > { %s741_s18 = smov [#allocation6]  }
 0x146   : > { %639 = dma.smem_to_vmem (%p965_p7), %s741_s18, 16, %s500_s21, [#allocation7]  }
 0x147   : > { %724 = dma.done.wait (%p965_p7), [#allocation7], 16  }
 0x148   : > { %726 = vsyncadd (%p965_p7), [#allocation7], 4294967280 }
 0x149   : > { %507 = sfence }
 0x14a PF: > { %s15_s17 = sadd.s32 1, %s737_s17   ;;  %s995_s15 = smov %s733_s16 }
 0x14b   : > { %p12_p1 = scmp.ge.s32.totalorder %s15_s17, 4   ;;  %s996_s16 = smov %s998_s19 }
 0x14d   :  { %14 = sbr.rel (!%p12_p1) target bundleno = 2 (0x2), region = 93 }
 0x154   :  { %513 = vsyncpa [#allocation7], 1 }
 0x155   :  { %515 = vsyncpa [#allocation7 + $0x1], 1 }

</bundles_post_ra>
